<compile_context>
chip_gen: v7x
topology: tpu7x:2x2x1
jax: 0.10.0
libtpu: 0.0.40
codegen_flags: <defaults>
</compile_context>

<pallas_src>
import jax
import jax.numpy as jnp
from jax.experimental import pallas as pl
from jax.experimental.pallas import tpu as pltpu

HID_DIM = 128
DROP_P = 0.5
MAX_BLOCK_B = 1024  # conservative per-step row cap; fits scoped VMEM on v5e/v6e/v7x


# ----------------------------- kernels ---------------------------------------


def _mlp_kernel_train(x_ref, w1_ref, b1_ref, m1_ref, w2_ref, b2_ref, m2_ref,
                      w3_ref, b3_ref, o_ref):
    # Layer 1: bf16 MXU matmul, f32 accumulate; bias/ReLU/dropout on the VPU in f32.
    h1 = jnp.dot(x_ref[...], w1_ref[...], preferred_element_type=jnp.float32)
    h1 = jnp.maximum(h1 + b1_ref[...], 0.0) * m1_ref[...]   # mask pre-scaled by 1/(1-p)

    # Layer 2
    h2 = jnp.dot(h1.astype(jnp.bfloat16), w2_ref[...],
                 preferred_element_type=jnp.float32)
    h2 = jnp.maximum(h2 + b2_ref[...], 0.0) * m2_ref[...]

    # Layer 3 (out_features=1): VPU multiply + lane reduce instead of an N=1 MXU matmul.
    out = jnp.sum(h2 * w3_ref[...], axis=-1, keepdims=True) + b3_ref[0]
    o_ref[...] = out.astype(o_ref.dtype)


def _mlp_kernel_eval(x_ref, w1_ref, b1_ref, w2_ref, b2_ref, w3_ref, b3_ref, o_ref):
    h1 = jnp.dot(x_ref[...], w1_ref[...], preferred_element_type=jnp.float32)
    h1 = jnp.maximum(h1 + b1_ref[...], 0.0)
    h2 = jnp.dot(h1.astype(jnp.bfloat16), w2_ref[...],
                 preferred_element_type=jnp.float32)
    h2 = jnp.maximum(h2 + b2_ref[...], 0.0)
    out = jnp.sum(h2 * w3_ref[...], axis=-1, keepdims=True) + b3_ref[0]
    o_ref[...] = out.astype(o_ref.dtype)


# ----------------------------- wrapper ----------------------------------------


def _round_up(x, m):
    return (x + m - 1) // m * m


def make_dropout_masks(key, batch):
    """Training-mode dropout masks, pre-scaled by 1/(1-p). Vary `key` per step."""
    k1, k2 = jax.random.split(key)
    scale = 1.0 / (1.0 - DROP_P)
    m1 = jax.random.bernoulli(k1, 1.0 - DROP_P, (batch, HID_DIM)).astype(jnp.float32) * scale
    m2 = jax.random.bernoulli(k2, 1.0 - DROP_P, (batch, HID_DIM)).astype(jnp.float32) * scale
    return m1, m2


def rewardf_forward(x, params, *, dropout_masks=None, block_b=None):
    """Forward pass.

    x: (B, D) float32
    params: dict with w1 (D,128), b1 (1,128), w2 (128,128), b2 (1,128), w3 (128,1), b3 (1,1)
    dropout_masks: optional (m1, m2), each (B, 128) float32 pre-scaled masks (training mode).
                   None -> eval mode (PyTorch module.eval()).
    returns: (B, 1) float32
    """
    B, D = x.shape
    if block_b is None:
        block_b = min(MAX_BLOCK_B, _round_up(B, 8))
    b_pad = _round_up(B, block_b)
    n_blocks = b_pad // block_b

    x_bf16 = x.astype(jnp.bfloat16)
    if b_pad != B:
        x_bf16 = jnp.pad(x_bf16, ((0, b_pad - B), (0, 0)))

    w1 = params["w1"].astype(jnp.bfloat16)
    w2 = params["w2"].astype(jnp.bfloat16)
    b1 = params["b1"].reshape(1, HID_DIM).astype(jnp.float32)
    b2 = params["b2"].reshape(1, HID_DIM).astype(jnp.float32)
    w3_row = params["w3"].reshape(1, HID_DIM).astype(jnp.float32)  # row form for VPU reduce
    b3 = params["b3"].reshape(1).astype(jnp.float32)               # scalar via SMEM

    # Batch-tiled inputs / output.
    x_spec = pl.BlockSpec((block_b, D), lambda i: (i, 0))
    m_spec = pl.BlockSpec((block_b, HID_DIM), lambda i: (i, 0))
    out_spec = pl.BlockSpec((block_b, 1), lambda i: (i, 0))
    # Weights/biases: constant block index -> stay resident in VMEM across batch blocks.
    w1_spec = pl.BlockSpec((D, HID_DIM), lambda i: (0, 0))
    w2_spec = pl.BlockSpec((HID_DIM, HID_DIM), lambda i: (0, 0))
    b_spec = pl.BlockSpec((1, HID_DIM), lambda i: (0, 0))
    w3_spec = pl.BlockSpec((1, HID_DIM), lambda i: (0, 0))
    b3_spec = pl.BlockSpec(memory_space=pltpu.MemorySpace.SMEM)

    cparams = pltpu.CompilerParams(dimension_semantics=("parallel",))
    out_shape = jax.ShapeDtypeStruct((b_pad, 1), jnp.float32)

    if dropout_masks is not None:
        m1, m2 = dropout_masks
        m1 = m1.astype(jnp.float32)
        m2 = m2.astype(jnp.float32)
        if b_pad != B:
            m1 = jnp.pad(m1, ((0, b_pad - B), (0, 0)))
            m2 = jnp.pad(m2, ((0, b_pad - B), (0, 0)))
        out = pl.pallas_call(
            _mlp_kernel_train,
            grid=(n_blocks,),
            in_specs=[x_spec, w1_spec, b_spec, m_spec,
                      w2_spec, b_spec, m_spec, w3_spec, b3_spec],
            out_specs=out_spec,
            out_shape=out_shape,
            compiler_params=cparams,
        )(x_bf16, w1, b1, m1, w2, b2, m2, w3_row, b3)
    else:
        out = pl.pallas_call(
            _mlp_kernel_eval,
            grid=(n_blocks,),
            in_specs=[x_spec, w1_spec, b_spec, w2_spec, b_spec, w3_spec, b3_spec],
            out_specs=out_spec,
            out_shape=out_shape,
            compiler_params=cparams,
        )(x_bf16, w1, b1, w2, b2, w3_row, b3)

    return out[:B]


# ----------------------------- init & reference -------------------------------


def init_params(key, input_dim):
    """PyTorch nn.Linear default init: U[-1/sqrt(fan_in), 1/sqrt(fan_in)]."""
    ks = jax.random.split(key, 6)

    def lin(kw, kb, fan_in, fan_out):
        bound = 1.0 / jnp.sqrt(jnp.float32(fan_in))
        w = jax.random.uniform(kw, (fan_in, fan_out), jnp.float32, -bound, bound)
        b = jax.random.uniform(kb, (1, fan_out), jnp.float32, -bound, bound)
        return w, b

    w1, b1 = lin(ks[0], ks[1], input_dim, HID_DIM)
    w2, b2 = lin(ks[2], ks[3], HID_DIM, HID_DIM)
    w3, b3 = lin(ks[4], ks[5], HID_DIM, 1)
    return {"w1": w1, "b1": b1, "w2": w2, "b2": b2, "w3": w3, "b3": b3}


def _reference(x, params, masks=None):
    """Pure-JAX reference with the same bf16-input / f32-accumulate numerics."""
    xb = x.astype(jnp.bfloat16)
    w1 = params["w1"].astype(jnp.bfloat16)
    w2 = params["w2"].astype(jnp.bfloat16)
    h1 = jnp.maximum(
        jnp.dot(xb, w1, preferred_element_type=jnp.float32) + params["b1"], 0.0)
    if masks is not None:
        h1 = h1 * masks[0]
    h2 = jnp.maximum(
        jnp.dot(h1.astype(jnp.bfloat16), w2, preferred_element_type=jnp.float32)
        + params["b2"], 0.0)
    if masks is not None:
        h2 = h2 * masks[1]
    return jnp.dot(h2, params["w3"]) + params["b3"]


# ----------------------------- self test --------------------------------------


if __name__ == "__main__":
    key = jax.random.PRNGKey(0)
    k_param, k_x, k_drop, k_x2, k_drop2 = jax.random.split(key, 5)

    batch, input_dim = 8, 32
    params = init_params(k_param, input_dim)
    x = jax.random.normal(k_x, (batch, input_dim), dtype=jnp.float32)

    # Training-mode forward (dropout active, matching PyTorch module default training=True).
    masks = make_dropout_masks(k_drop, batch)
    out_train = rewardf_forward(x, params, dropout_masks=masks)
    jax.block_until_ready(out_train)

    # Eval-mode forward.
    out_eval = rewardf_forward(x, params, dropout_masks=None)
    jax.block_until_ready(out_eval)

    ref_train = _reference(x, params, masks)
    ref_eval = _reference(x, params, None)
    assert out_train.shape == (batch, 1)
    assert jnp.allclose(out_train, ref_train, atol=1e-3, rtol=1e-3)
    assert jnp.allclose(out_eval, ref_eval, atol=1e-3, rtol=1e-3)

    # Multi-block grid + batch padding path (block_b=8, B=20 -> 3 grid steps, pad to 24).
    batch2 = 20
    x2 = jax.random.normal(k_x2, (batch2, input_dim), dtype=jnp.float32)
    masks2 = make_dropout_masks(k_drop2, batch2)
    out2 = rewardf_forward(x2, params, dropout_masks=masks2, block_b=8)
    jax.block_until_ready(out2)
    ref2 = _reference(x2, params, masks2)
    assert out2.shape == (batch2, 1)
    assert jnp.allclose(out2, ref2, atol=1e-3, rtol=1e-3)

    print("KERNEL_OK")
</pallas_src>

<mosaic_0001>
module attributes {stable_mosaic.version = 11 : i64} {
  func.func @_mlp_kernel_train(%arg0: i32, %arg1: memref<8x32xbf16, #tpu.memory_space<vmem>>, %arg2: memref<32x128xbf16, #tpu.memory_space<vmem>>, %arg3: memref<1x128xf32, #tpu.memory_space<vmem>>, %arg4: memref<8x128xf32, #tpu.memory_space<vmem>>, %arg5: memref<128x128xbf16, #tpu.memory_space<vmem>>, %arg6: memref<1x128xf32, #tpu.memory_space<vmem>>, %arg7: memref<8x128xf32, #tpu.memory_space<vmem>>, %arg8: memref<1x128xf32, #tpu.memory_space<vmem>>, %arg9: memref<1xf32, #tpu.memory_space<smem>>, %arg10: memref<8x1xf32, #tpu.memory_space<vmem>>) attributes {dimension_semantics = [#tpu.dimension_semantics<parallel>], iteration_bounds = array<i64: 1>, scalar_prefetch = 0 : i64, scratch_operands = 0 : i64, tpu.core_type = #tpu.core_type<tc>, window_params = [{transform_indices = @transform_0, window_bounds = array<i64: 8, 32>}, {pipeline_mode = #tpu.pipeline_mode<synchronous>, transform_indices = @transform_1, window_bounds = array<i64: 32, 128>}, {pipeline_mode = #tpu.pipeline_mode<synchronous>, transform_indices = @transform_2, window_bounds = array<i64: 1, 128>}, {transform_indices = @transform_3, window_bounds = array<i64: 8, 128>}, {pipeline_mode = #tpu.pipeline_mode<synchronous>, transform_indices = @transform_4, window_bounds = array<i64: 128, 128>}, {pipeline_mode = #tpu.pipeline_mode<synchronous>, transform_indices = @transform_5, window_bounds = array<i64: 1, 128>}, {transform_indices = @transform_6, window_bounds = array<i64: 8, 128>}, {pipeline_mode = #tpu.pipeline_mode<synchronous>, transform_indices = @transform_7, window_bounds = array<i64: 1, 128>}, {transform_indices = @transform_8, window_bounds = array<i64: 1>}, {transform_indices = @transform_9, window_bounds = array<i64: 8, 1>}]} {
    %c0 = arith.constant 0 : index
    %c0_0 = arith.constant 0 : index
    %0 = vector.load %arg1[%c0, %c0_0] : memref<8x32xbf16, #tpu.memory_space<vmem>>, vector<8x32xbf16>
    %c0_1 = arith.constant 0 : index
    %c0_2 = arith.constant 0 : index
    %1 = vector.load %arg2[%c0_1, %c0_2] : memref<32x128xbf16, #tpu.memory_space<vmem>>, vector<32x128xbf16>
    %cst = arith.constant dense<0.000000e+00> : vector<8x128xf32>
    %2 = tpu.matmul %0, %1, %cst {dimension_numbers = #tpu.dot_dimension_numbers<[1], [0], [0], [1], [0, 0, 1, 1], [], []>} : vector<8x32xbf16>, vector<32x128xbf16>, vector<8x128xf32> -> vector<8x128xf32>
    %c0_3 = arith.constant 0 : index
    %c0_4 = arith.constant 0 : index
    %3 = vector.load %arg3[%c0_3, %c0_4] : memref<1x128xf32, #tpu.memory_space<vmem>>, vector<1x128xf32>
    %4 = vector.broadcast %3 : vector<1x128xf32> to vector<8x128xf32>
    %5 = arith.addf %2, %4 : vector<8x128xf32>
    %cst_5 = arith.constant 0.000000e+00 : f32
    %6 = vector.broadcast %cst_5 : f32 to vector<8x128xf32>
    %7 = arith.maximumf %5, %6 : vector<8x128xf32>
    %c0_6 = arith.constant 0 : index
    %c0_7 = arith.constant 0 : index
    %8 = vector.load %arg4[%c0_6, %c0_7] : memref<8x128xf32, #tpu.memory_space<vmem>>, vector<8x128xf32>
    %9 = arith.mulf %7, %8 : vector<8x128xf32>
    %10 = arith.truncf %9 : vector<8x128xf32> to vector<8x128xbf16>
    %c0_8 = arith.constant 0 : index
    %c0_9 = arith.constant 0 : index
    %11 = vector.load %arg5[%c0_8, %c0_9] : memref<128x128xbf16, #tpu.memory_space<vmem>>, vector<128x128xbf16>
    %cst_10 = arith.constant dense<0.000000e+00> : vector<8x128xf32>
    %12 = tpu.matmul %10, %11, %cst_10 {dimension_numbers = #tpu.dot_dimension_numbers<[1], [0], [0], [1], [0, 0, 1, 1], [], []>} : vector<8x128xbf16>, vector<128x128xbf16>, vector<8x128xf32> -> vector<8x128xf32>
    %c0_11 = arith.constant 0 : index
    %c0_12 = arith.constant 0 : index
    %13 = vector.load %arg6[%c0_11, %c0_12] : memref<1x128xf32, #tpu.memory_space<vmem>>, vector<1x128xf32>
    %14 = vector.broadcast %13 : vector<1x128xf32> to vector<8x128xf32>
    %15 = arith.addf %12, %14 : vector<8x128xf32>
    %cst_13 = arith.constant 0.000000e+00 : f32
    %16 = vector.broadcast %cst_13 : f32 to vector<8x128xf32>
    %17 = arith.maximumf %15, %16 : vector<8x128xf32>
    %c0_14 = arith.constant 0 : index
    %c0_15 = arith.constant 0 : index
    %18 = vector.load %arg7[%c0_14, %c0_15] : memref<8x128xf32, #tpu.memory_space<vmem>>, vector<8x128xf32>
    %19 = arith.mulf %17, %18 : vector<8x128xf32>
    %c0_16 = arith.constant 0 : index
    %c0_17 = arith.constant 0 : index
    %20 = vector.load %arg8[%c0_16, %c0_17] : memref<1x128xf32, #tpu.memory_space<vmem>>, vector<1x128xf32>
    %21 = vector.broadcast %20 : vector<1x128xf32> to vector<8x128xf32>
    %22 = arith.mulf %19, %21 : vector<8x128xf32>
    %cst_18 = arith.constant dense<0.000000e+00> : vector<8xf32>
    %23 = vector.multi_reduction <add>, %22, %cst_18 [1] : vector<8x128xf32> to vector<8xf32>
    %24 = vector.shape_cast %23 : vector<8xf32> to vector<8x1xf32>
    %c0_19 = arith.constant 0 : index
    %25 = memref.load %arg9[%c0_19] : memref<1xf32, #tpu.memory_space<smem>>
    %26 = vector.broadcast %25 : f32 to vector<8x1xf32>
    %27 = arith.addf %24, %26 : vector<8x1xf32>
    %c0_20 = arith.constant 0 : index
    %c0_21 = arith.constant 0 : index
    %28 = vector.load %arg10[%c0_20, %c0_21] : memref<8x1xf32, #tpu.memory_space<vmem>>, vector<8x1xf32>
    tpu.vector_store %arg10[%c0_20, %c0_21], %27 {strides = array<i32>} : memref<8x1xf32, #tpu.memory_space<vmem>>, vector<8x1xf32>,
    return
  }
  func.func @transform_0(%arg0: i32) -> (i32, i32) {
    %c0_i32 = arith.constant 0 : i32
    %c0_i32_0 = arith.constant 0 : i32
    return %arg0, %c0_i32 : i32, i32
  }
  func.func @transform_1(%arg0: i32) -> (i32, i32) {
    %c0_i32 = arith.constant 0 : i32
    %c0_i32_0 = arith.constant 0 : i32
    %c0_i32_1 = arith.constant 0 : i32
    return %c0_i32, %c0_i32_0 : i32, i32
  }
  func.func @transform_2(%arg0: i32) -> (i32, i32) {
    %c0_i32 = arith.constant 0 : i32
    %c0_i32_0 = arith.constant 0 : i32
    %c0_i32_1 = arith.constant 0 : i32
    return %c0_i32, %c0_i32_0 : i32, i32
  }
  func.func @transform_3(%arg0: i32) -> (i32, i32) {
    %c0_i32 = arith.constant 0 : i32
    %c0_i32_0 = arith.constant 0 : i32
    return %arg0, %c0_i32 : i32, i32
  }
  func.func @transform_4(%arg0: i32) -> (i32, i32) {
    %c0_i32 = arith.constant 0 : i32
    %c0_i32_0 = arith.constant 0 : i32
    %c0_i32_1 = arith.constant 0 : i32
    return %c0_i32, %c0_i32_0 : i32, i32
  }
  func.func @transform_5(%arg0: i32) -> (i32, i32) {
    %c0_i32 = arith.constant 0 : i32
    %c0_i32_0 = arith.constant 0 : i32
    %c0_i32_1 = arith.constant 0 : i32
    return %c0_i32, %c0_i32_0 : i32, i32
  }
  func.func @transform_6(%arg0: i32) -> (i32, i32) {
    %c0_i32 = arith.constant 0 : i32
    %c0_i32_0 = arith.constant 0 : i32
    return %arg0, %c0_i32 : i32, i32
  }
  func.func @transform_7(%arg0: i32) -> (i32, i32) {
    %c0_i32 = arith.constant 0 : i32
    %c0_i32_0 = arith.constant 0 : i32
    %c0_i32_1 = arith.constant 0 : i32
    return %c0_i32, %c0_i32_0 : i32, i32
  }
  func.func @transform_8(%arg0: i32) -> i32 {
    %c0_i32 = arith.constant 0 : i32
    %c0_i32_0 = arith.constant 0 : i32
    return %c0_i32 : i32
  }
  func.func @transform_9(%arg0: i32) -> (i32, i32) {
    %c0_i32 = arith.constant 0 : i32
    %c0_i32_0 = arith.constant 0 : i32
    return %arg0, %c0_i32 : i32, i32
  }
}

</mosaic_0001>

<bundles_post_ra>
// kernel: tpu_custom_call.1
= control target key start
LH: loop header
LB: loop body
LE: loop exit
PB: predicated region body
PF: predicated region fallthrough
CT: control target
= control target key end

     0   :  { %15 = vsyncpa [#allocation4], 0  ;;  %s541_s0 = inlined_call_operand.hbm [shape: bf16[8,32], index: 0, kind: input, shape index: {}]   ;;  %s542_s1 = inlined_call_operand.hbm [shape: bf16[32,128], index: 1, kind: input, shape index: {}]   ;;  %s543_s2 = inlined_call_operand.vmem [shape: f32[1,128], index: 2, kind: input, shape index: {}]   ;;  %s544_s3 = inlined_call_operand.vmem [shape: f32[8,128], index: 3, kind: input, shape index: {}]   ;;  %s545_s4 = inlined_call_operand.hbm [shape: bf16[128,128], index: 4, kind: input, shape index: {}]   ;;  %s546_s5 = inlined_call_operand.vmem [shape: f32[1,128], index: 5, kind: input, shape index: {}]   ;;  %s547_s6 = inlined_call_operand.vmem [shape: f32[8,128], index: 6, kind: input, shape index: {}]   ;;  %s548_s7 = inlined_call_operand.vmem [shape: f32[1,128], index: 7, kind: input, shape index: {}]   ;;  %s549_s8 = inlined_call_operand.<no memory space> [shape: f32[1], index: 8, kind: input, shape index: {}]   ;;  %s550_s9 = inlined_call_operand.vmem [shape: f32[8,1], index: 9, kind: output, shape index: {}]  }
   0x1   :  { %16 = vsyncpa [#allocation6], 0  ;;  %s421_s30 = smov [#allocation5]   ;;  %s351_s13 = scalar_lea.hbm %s542_s1, 256 }
   0x2   :  { %s32_s10 = sshll.u32 %s421_s30, 4  ;;  %p352_p0 = scmp.ne.s32.totalorder %s542_s1, %s351_s13  ;;  %s33_s10 = int_to_ptr.vmem [resolvable:$true] %s32_s10 }
   0x3   :  { %p355_p1 = scmp.lt.u32.totalorder %s351_s13, %s542_s1 }
   0x5   :  { %p357_p2 = pnand %p355_p1, %p352_p0 }
   0x7   :  { %360 = shalt.err (!%p357_p2)
}
   0x8   :  { %s361_s18 = scalar_lea.vmem %s33_s10, 256  ;;  %p366_p4 = scmp.lt.s32.totalorder %s33_s10, %s33_s10 }
   0x9   :  { %p362_p3 = scmp.ne.s32.totalorder %s33_s10, %s361_s18  ;;  %p367_p5 = scmp.lt.s32.totalorder %s361_s18, %s361_s18 }
   0xb   :  { %p368_p6 = por %p367_p5, %p366_p4 }
   0xd   :  { %p369_p7 = pnand %p368_p6, %p362_p3 }
   0xf   :  { %372 = shalt.err (!%p369_p7)
}
  0x10   :  { %s422_s19 = smov 64   ;;  %s423_s20 = smov 4  }
  0x11   :  { %38 = dma.hbm_to_vmem [thread:$0]  %s542_s1, 256, %s33_s10, [#allocation6], %s422_s19, %s422_s19, %s423_s20  }
  0x12   :  { %s424_s23 = smov [#allocation3]   ;;  %s425_s25 = smov [#allocation7]  }
  0x13   :  { %s23_s24 = sshll.u32 %s424_s23, 4  ;;  %s48_s26 = sshll.u32 %s425_s25, 4  ;;  %s24_s24 = int_to_ptr.vmem [resolvable:$true] %s23_s24  ;;  %s49_s26 = int_to_ptr.vmem [resolvable:$true] %s48_s26 }
  0x14   :  { %s373_s29 = scalar_lea.hbm %s541_s0, 64 }
  0x15   :  { %p374_p8 = scmp.ne.s32.totalorder %s541_s0, %s373_s29  ;;  %p377_p9 = scmp.lt.u32.totalorder %s373_s29, %s541_s0 }
  0x17   :  { %p379_p10 = pnand %p377_p9, %p374_p8 }
  0x19   :  { %382 = shalt.err (!%p379_p10)
}
  0x1a   :  { %s383_s1 = scalar_lea.vmem %s24_s24, 64  ;;  %p388_p12 = scmp.lt.s32.totalorder %s24_s24, %s24_s24 }
  0x1b   :  { %p384_p11 = scmp.ne.s32.totalorder %s24_s24, %s383_s1  ;;  %p389_p13 = scmp.lt.s32.totalorder %s383_s1, %s383_s1 }
  0x1d   :  { %p390_p0 = por %p389_p13, %p388_p12 }
  0x1f   :  { %p391_p1 = pnand %p390_p0, %p384_p11 }
  0x21   :  { %394 = shalt.err (!%p391_p1)
}
  0x22   :  { %26 = dma.hbm_to_vmem [thread:$0]  %s541_s0, 64, %s24_s24, [#allocation4]  }
  0x23   :  { %s395_s17 = scalar_lea.hbm %s545_s4, 1024 }
  0x24   :  { %p396_p2 = scmp.ne.s32.totalorder %s545_s4, %s395_s17  ;;  %p399_p3 = scmp.lt.u32.totalorder %s395_s17, %s545_s4 }
  0x26   :  { %p401_p4 = pnand %p399_p3, %p396_p2 }
  0x28   :  { %404 = shalt.err (!%p401_p4)
}
  0x29   :  { %s405_s25 = scalar_lea.vmem %s49_s26, 1024  ;;  %p410_p6 = scmp.lt.s32.totalorder %s49_s26, %s49_s26 }
  0x2a   :  { %p406_p5 = scmp.ne.s32.totalorder %s49_s26, %s405_s25  ;;  %p411_p7 = scmp.lt.s32.totalorder %s405_s25, %s405_s25 }
  0x2c   :  { %p412_p8 = por %p411_p7, %p410_p6 }
  0x2e   :  { %p413_p9 = pnand %p412_p8, %p406_p5 }
  0x30   :  { %416 = shalt.err (!%p413_p9)
}
  0x31   :  { %54 = dma.hbm_to_vmem [thread:$0]  %s545_s4, 1024, %s49_s26, [#allocation6], %s422_s19, %s422_s19, %s423_s20  }
  0x32   :  { %417 = dma.done.wait [#allocation4], 64  }
  0x33   :  { %418 = vsyncadd [#allocation4], 4294967232 }
  0x34   :  { %419 = dma.done.wait [#allocation6], 1280  }
  0x35   :  { %420 = vsyncadd [#allocation6], 4294966016  ;;  %v426_v0 = vmov 0.0   ;;  %vm427_vm0 = vmmov 0   ;;  %v341_v1 = vld [vmem:[#allocation5] sm:$0xff]   ;;  %v342_v2 = vld [vmem:[#allocation5 + $0x8] sm:$0xff]   ;;  %v270_v33 = vstv %s549_s8 }
  0x36   :  { %306 = vmatprep.subr.bf16.mxu0 %v426_v0  ;;  %310 = vmatprep.mubr.msk.bf16.mxu0 %vm427_vm0, %v426_v0  ;;  %v343_v3 = vld [vmem:[#allocation7] sm:$0xff]   ;;  %vm97_vm1 = vcmask 261120   ;;  %v344_v4 = vld [vmem:[#allocation7 + $0x8] sm:$0xff]   ;;  %v345_v6 = vld [vmem:[#allocation7 + $0x10] sm:$0xff]   ;;  %vm272_vm2 = vcmask 7168  }
  0x37   :  { %314 = vmatprep.subr.bf16.mxu1 %v426_v0  ;;  %330 = vmatprep.mubr.msk.bf16.mxu1 %vm427_vm0, %v426_v0  ;;  %v73_v5 = vld [vmem:[#allocation3] sm:$0xf]  ;;  %v346_v7 = vld [vmem:[#allocation7 + $0x18] sm:$0xff]   ;;  %v347_v8 = vld [vmem:[#allocation7 + $0x20] sm:$0xff]  }
  0x38   :  { %307 = vmatpush3.bf16.msra.mxu0 %v341_v1  ;;  %315 = vmatpush3.bf16.msra.mxu1 %v343_v3  ;;  %v348_v9 = vld [vmem:[#allocation7 + $0x28] sm:$0xff]   ;;  %v349_v10 = vld [vmem:[#allocation7 + $0x30] sm:$0xff]   ;;  %v350_v11 = vld [vmem:[#allocation7 + $0x38] sm:$0xff]  }
  0x39   :  { %308 = vmatprep.subr.bf16.mxu0 %v426_v0  ;;  %316 = vmatprep.subr.bf16.mxu1 %v426_v0  ;;  %v280_v12 = vld [vmem:[%s543_s2] ss:$0 sm:$0xff] }
  0x3a   :  { %v142_v16 = vld [vmem:[%s544_s3] sm:$0xff] }
  0x3b   :  { %v284_v22 = vld [vmem:[%s546_s5] ss:$0 sm:$0xff] }
  0x3c   :  { %309 = vmatpush3.bf16.msra.mxu0 %v342_v2  ;;  %317 = vmatpush3.bf16.msra.mxu1 %v344_v4  ;;  %v257_v27 = vld [vmem:[%s547_s6] sm:$0xff] }
  0x3d   :  { %318 = vmatprep.subr.bf16.mxu1 %v426_v0  ;;  %v293_v30 = vld [vmem:[%s548_s7] ss:$0 sm:$0xff] }
  0x3f   :  { %311 = vmatmul.mubr.msk.bf16.vlgmr.msra.gmra.mrb[0].mxu0 %vm97_vm1, %v73_v5 }
  0x40   :  { %319 = vmatpush3.bf16.msra.mxu1 %v345_v6 }
  0x41   :  { %320 = vmatprep.subr.bf16.mxu1 %v426_v0 }
  0x44   :  { %321 = vmatpush3.bf16.msra.mxu1 %v346_v7 }
  0x45   :  { %322 = vmatprep.subr.bf16.mxu1 %v426_v0 }
  0x48   :  { %323 = vmatpush3.bf16.msra.mxu1 %v347_v8 }
  0x49   :  { %324 = vmatprep.subr.bf16.mxu1 %v426_v0 }
  0x4c   :  { %325 = vmatpush3.bf16.msra.mxu1 %v348_v9 }
  0x4d   :  { %326 = vmatprep.subr.bf16.mxu1 %v426_v0 }
  0x50   :  { %327 = vmatpush3.bf16.msra.mxu1 %v349_v10 }
  0x51   :  { %328 = vmatprep.subr.bf16.mxu1 %v426_v0 }
  0x54   :  { %329 = vmatpush3.bf16.msra.mxu1 %v350_v11 }
 0x112   :  { %v135_v13 = vpop.f32.mrb[0].mxu0 }
 0x113   :  { %v136_v14 = vadd.f32 %v280_v12, %v135_v13  ;;  %v312_v15 = vpop.f32.mrb[1].mxu0 }
 0x114   :  { %v138_v17 = vpop.f32.mrb[2].mxu0 }
 0x115   :  { %v141_v18 = vmax.f32 %v136_v14, 0.0  ;;  %v313_v19 = vpop.f32.mrb[3].mxu0 }
 0x117   :  { %v143_v20 = vmul.f32 %v142_v16, %v141_v18 }
 0x119   :  { %v144_v21 = vpack.c.bf16 %v143_v20, %v143_v20 }
 0x11b   :  { %331 = vmatmul.mubr.bf16.vlgmr.msra.gmra.mrb[0].mxu1 %v144_v21 }
 0x1ee   :  { %v250_v23 = vpop.f32.mrb[0].mxu1 }
 0x1ef   :  { %v251_v24 = vadd.f32 %v284_v22, %v250_v23  ;;  %v332_v25 = vpop.f32.mrb[1].mxu1 }
 0x1f0   :  { %v253_v26 = vpop.f32.mrb[2].mxu1 }
 0x1f1   :  { %v256_v28 = vmax.f32 %v251_v24, 0.0  ;;  %v333_v29 = vpop.f32.mrb[3].mxu1 }
 0x1f3   :  { %v258_v31 = vmul.f32 %v257_v27, %v256_v28 }
 0x1f5   :  { %v266_v32 = vmul.f32 %v293_v30, %v258_v31 }
 0x1f7   :  { %267 = vadd.xlane.f32.xlu0 %v266_v32 }
 0x284   :  { %v268_v34 = vpop.xlane.xlu0 %267 }
 0x285   :  { %v271_v35 = vadd.f32 %v270_v33, %v268_v34 }
 0x287   :  { %273 = vst.msk [vmem:[%s550_s9] sm:$0xff] %vm272_vm2, %v271_v35 }
 0x288   :  { %278 = vsyncpa [#allocation4], 1 }
 0x289   :  { %279 = vsyncpa [#allocation6], 1 }

</bundles_post_ra>
